<compile_context>
chip_gen: v7x
topology: tpu7x:2x2x1
jax: 0.10.0
libtpu: 0.0.40
codegen_flags: <defaults>
</compile_context>

<pallas_src>
import functools

import jax
import jax.numpy as jnp
from jax import lax
from jax.experimental import pallas as pl
from jax.experimental.pallas import tpu as pltpu

_LANES = 128
_DEFAULT_ROWS_PER_BLOCK = 8192          # 8192*128*4B = 4 MiB per f32 input block
_VMEM_INPUT_BUDGET = 48 * 1024 * 1024   # cap on double-buffered input blocks
_MIN_PALLAS_BYTES = 256 * 1024          # below this, plain jnp beats kernel launch


def _dice_kernel(p_ref, t_ref, loss_ref, num_acc, den_acc, *,
                 smooth, p, rows_total, rb, mask_last, binary_target):
    """Accumulates per-batch-row num/den over the row-tile grid axis (axis 1).

    Blocks: inputs (nb, rb, 128); accumulators (nb, 1, 128) lane partials;
    output (nb, 1, 128) per-row loss splat (lane-dense).
    """
    j = pl.program_id(1)
    last_j = pl.num_programs(1) - 1

    @pl.when(j == 0)
    def _init():
        num_acc[...] = jnp.zeros_like(num_acc)
        den_acc[...] = jnp.zeros_like(den_acc)

    def num_den(pred, targ):
        num_part = pred * targ
        if p == 2:
            den_part = pred * pred + (targ if binary_target else targ * targ)
        elif p == 1:
            den_part = pred + targ
        else:
            den_part = pred ** p + targ ** p      # general (EUP) path
        return num_part, den_part

    def accumulate_block():
        # Unmasked fast path: (nb, rb, 128) -> per-row (nb, 1, 128) partials.
        num_part, den_part = num_den(p_ref[...].astype(jnp.float32),
                                     t_ref[...].astype(jnp.float32))
        num_acc[...] += jnp.sum(num_part, axis=1, keepdims=True)
        den_acc[...] += jnp.sum(den_part, axis=1, keepdims=True)

    if mask_last:
        # Ragged R: only the FINAL row tile pays for the mask; every other
        # grid step runs the plain path (review item #1).
        @pl.when(j < last_j)
        def _fast():
            accumulate_block()

        @pl.when(j == last_j)
        def _masked():
            # Masking implies num_j > 1, which implies nb == 1 -> 2-D work.
            rem = rows_total % rb                       # static valid-row count
            pred = p_ref[0].astype(jnp.float32)         # (rb, 128)
            targ = t_ref[0].astype(jnp.float32)
            # Full-width iota is deliberately kept here: it only ever runs on
            # this single tile, so its cost is negligible and the lowering is
            # the proven one.
            row_ids = lax.broadcasted_iota(jnp.int32, (rb, _LANES), 0)
            valid = row_ids < rem
            pred = jnp.where(valid, pred, 0.0)
            targ = jnp.where(valid, targ, 0.0)
            num_part, den_part = num_den(pred, targ)
            if p <= 0:
                # 0**p != 0 for p <= 0; re-mask the denominator contribution.
                den_part = jnp.where(valid, den_part, 0.0)
            num_acc[0] += jnp.sum(num_part, axis=0, keepdims=True)
            den_acc[0] += jnp.sum(den_part, axis=0, keepdims=True)
    else:
        accumulate_block()

    @pl.when(j == last_j)
    def _finalize():
        num = jnp.sum(num_acc[...], axis=2, keepdims=True) + smooth   # (nb,1,1)
        den = jnp.sum(den_acc[...], axis=2, keepdims=True) + smooth
        loss_ref[...] = jnp.broadcast_to(1.0 - num / den, loss_ref.shape)


def _per_row_dice_ref(pred2d, targ2d, smooth, p):
    pred = pred2d.astype(jnp.float32)
    targ = targ2d.astype(jnp.float32)
    num = jnp.sum(pred * targ, axis=1) + smooth
    den = jnp.sum(pred ** p + targ ** p, axis=1) + smooth
    return 1.0 - num / den


def _apply_reduction(loss, reduction):
    if reduction == "mean":
        return jnp.mean(loss)
    elif reduction == "sum":
        return jnp.sum(loss)
    elif reduction == "none":
        return loss
    else:
        raise Exception("Unexpected reduction {}".format(reduction))


def binary_dice_loss(predict, target, *, smooth=1.0, p=2, reduction="mean",
                     rows_per_block=_DEFAULT_ROWS_PER_BLOCK,
                     min_pallas_bytes=_MIN_PALLAS_BYTES,
                     assume_binary_target=False):
    """Pallas implementation of BinaryDiceLoss.forward.

    rows_per_block: sublane rows (each row = 128 lanes) processed per grid
    step; clamped so the double-buffered input blocks stay under 48 MiB.
    min_pallas_bytes: inputs smaller than this use a plain-jnp fast path.
    assume_binary_target: if True and p == 2, uses targ instead of targ*targ.
    """
    assert predict.shape[0] == target.shape[0], \
        "predict & target batch size don't match"
    n = predict.shape[0]

    # Flatten [N, *] -> [N, D] (matches .contiguous().view(N, -1)).
    pred2d = predict.reshape(n, -1)
    targ2d = target.reshape(n, -1)
    d = pred2d.shape[1]

    in_bytes = (pred2d.size * jnp.dtype(pred2d.dtype).itemsize
                + targ2d.size * jnp.dtype(targ2d.dtype).itemsize)
    ragged_d = (d % _LANES) != 0

    # Fast path: tiny inputs (launch overhead dominates), or p <= 0 with a
    # lane-ragged D (zero padding is only sum-neutral for p > 0).
    if in_bytes < min_pallas_bytes or (ragged_d and p <= 0):
        return _apply_reduction(_per_row_dice_ref(pred2d, targ2d, smooth, p),
                                reduction)

    if ragged_d:
        # TODO(synk): this pad is a full HBM read+write of both tensors; a
        # copy-free lane-ragged path needs either a 2-D (sublane-wasting)
        # layout or manual DMA, neither of which is a clear win here.
        d128 = pl.cdiv(d, _LANES) * _LANES
        pred2d = jnp.pad(pred2d, ((0, 0), (0, d128 - d)))
        targ2d = jnp.pad(targ2d, ((0, 0), (0, d128 - d)))
        d = d128
    r = d // _LANES
    pred3d = pred2d.reshape(n, r, _LANES)   # metadata-only reshape
    targ3d = targ2d.reshape(n, r, _LANES)

    # Sublane granularity from dtype packing: 8 (32-bit), 16 (16-bit), 32 (8-bit).
    min_item = min(jnp.dtype(pred3d.dtype).itemsize,
                   jnp.dtype(targ3d.dtype).itemsize)
    sub = max(8, 32 // max(int(min_item), 1))

    # Clamp the per-step sublane-row budget so 2 inputs x 2 buffers fit the
    # VMEM budget (safe on v7x's 64 MiB physical VMEM with headroom).
    bytes_per_row = _LANES * (jnp.dtype(pred3d.dtype).itemsize
                              + jnp.dtype(targ3d.dtype).itemsize)
    budget_rows = max(sub, _VMEM_INPUT_BUDGET // (2 * bytes_per_row))
    rows = min(max(int(rows_per_block), sub), int(budget_rows))
    rows = max(sub, (rows // sub) * sub)

    if r <= rows:
        rb, num_j, mask_last = r, 1, False        # single row-tile: never masked
    else:
        rb = rows                                 # multiple of `sub` (>= 8)
        num_j = pl.cdiv(r, rb)
        mask_last = (r % rb) != 0

    # Pack multiple batch rows per block when D is small so each grid step
    # still moves a decent amount of data (amortizes ~0.35us/step overhead).
    nb = max(1, min(n, rows // rb))
    num_i = pl.cdiv(n, nb)
    # TODO(synk): for N == 1 on v7x only one TensorCore is used; a core-split
    # of the row-tile reduction (partial num/den per core) would recover ~2x.

    kernel = functools.partial(
        _dice_kernel, smooth=float(smooth), p=p, rows_total=r, rb=rb,
        mask_last=mask_last, binary_target=bool(assume_binary_target))

    block_bytes = 2 * nb * rb * bytes_per_row     # double-buffered input blocks
    vmem_limit = int(min(56 * 1024 * 1024,
                         max(32 * 1024 * 1024, block_bytes + 4 * 1024 * 1024)))

    per_row = pl.pallas_call(
        kernel,
        out_shape=jax.ShapeDtypeStruct((n, 1, _LANES), jnp.float32),
        grid_spec=pltpu.PrefetchScalarGridSpec(
            num_scalar_prefetch=0,
            grid=(num_i, num_j),                  # reduction (row-tile) axis last
            in_specs=[
                pl.BlockSpec((nb, rb, _LANES), lambda i, j: (i, j, 0)),
                pl.BlockSpec((nb, rb, _LANES), lambda i, j: (i, j, 0)),
            ],
            out_specs=pl.BlockSpec((nb, 1, _LANES), lambda i, j: (i, 0, 0)),
            scratch_shapes=[
                pltpu.VMEM((nb, 1, _LANES), jnp.float32),  # num lane partials
                pltpu.VMEM((nb, 1, _LANES), jnp.float32),  # den lane partials
            ],
        ),
        compiler_params=pltpu.CompilerParams(
            # Batch blocks are independent -> parallel (megacore); the
            # row-tile axis is the reduction -> arbitrary.
            dimension_semantics=("parallel", "arbitrary"),
            vmem_limit_bytes=vmem_limit,
        ),
    )(pred3d, targ3d)

    loss = per_row[:, 0, 0]   # [N]
    return _apply_reduction(loss, reduction)


if __name__ == "__main__":
    key = jax.random.PRNGKey(0)
    keys = jax.random.split(key, 8)

    def ref(predict, target, smooth=1.0, p=2, reduction="mean"):
        nn = predict.shape[0]
        loss = _per_row_dice_ref(predict.reshape(nn, -1),
                                 target.reshape(nn, -1), smooth, p)
        return _apply_reduction(loss, reduction)

    # 1) Canonical [N, C, H, W] usage, lane-aligned D=1024, multi-batch-row
    #    blocking (nb=2), reduction='mean'. min_pallas_bytes=0 forces the
    #    Pallas path at these deliberately small demo shapes.
    n, c, h, w = 2, 4, 16, 16
    predict = jax.nn.sigmoid(jax.random.normal(keys[0], (n, c, h, w), jnp.float32))
    target = (jax.random.uniform(keys[1], (n, c, h, w)) > 0.5).astype(jnp.float32)
    out = jax.block_until_ready(binary_dice_loss(predict, target,
                                                 min_pallas_bytes=0))
    assert jnp.allclose(out, ref(predict, target), atol=1e-5, rtol=1e-5), \
        (out, ref(predict, target))

    # 2) Ragged row-tile path: R=9, rb=8 -> one unmasked block + one masked
    #    last block per batch row; reduction='none'.
    p2 = jax.nn.sigmoid(jax.random.normal(keys[2], (2, 9, 8, 16), jnp.float32))
    t2 = (jax.random.uniform(keys[3], (2, 9, 8, 16)) > 0.5).astype(jnp.float32)
    out2 = jax.block_until_ready(binary_dice_loss(
        p2, t2, reduction="none", rows_per_block=8, min_pallas_bytes=0))
    assert jnp.allclose(out2, ref(p2, t2, reduction="none"),
                        atol=1e-5, rtol=1e-5), (out2, ref(p2, t2, reduction="none"))

    # 3) bf16 predict (halves the dominant HBM traffic), sublane granularity
    #    16, three row tiles with a masked tail; reduction='sum'.
    p3 = jax.nn.sigmoid(
        jax.random.normal(keys[4], (2, 5, 32, 32), jnp.float32)).astype(jnp.bfloat16)
    t3 = (jax.random.uniform(keys[5], (2, 5, 32, 32)) > 0.5).astype(jnp.float32)
    out3 = jax.block_until_ready(binary_dice_loss(
        p3, t3, reduction="sum", rows_per_block=16, min_pallas_bytes=0))
    assert jnp.allclose(out3, ref(p3, t3, reduction="sum"),
                        atol=1e-4, rtol=1e-4), (out3, ref(p3, t3, reduction="sum"))

    # 4) Ragged batch blocking (N=3, nb=2 -> clipped last batch block) plus
    #    the lane-ragged D pad branch (D=1000 -> 1024); reduction='mean'.
    p4 = jax.nn.sigmoid(jax.random.normal(keys[6], (3, 10, 10, 10), jnp.float32))
    t4 = (jax.random.uniform(keys[7], (3, 10, 10, 10)) > 0.5).astype(jnp.float32)
    out4 = jax.block_until_ready(binary_dice_loss(
        p4, t4, reduction="mean", rows_per_block=16, min_pallas_bytes=0))
    assert jnp.allclose(out4, ref(p4, t4, reduction="mean"),
                        atol=1e-5, rtol=1e-5), (out4, ref(p4, t4, reduction="mean"))

    # 5) Small-input fast path (default threshold): no pallas_call launched.
    out5 = jax.block_until_ready(binary_dice_loss(predict, target))
    assert jnp.allclose(out5, ref(predict, target), atol=1e-6, rtol=1e-6), \
        (out5, ref(predict, target))

    print("KERNEL_OK")
</pallas_src>

<mosaic_0001>
module attributes {stable_mosaic.version = 11 : i64} {
  func.func @_dice_kernel(%arg0: i32, %arg1: i32, %arg2: memref<2x8x128xf32, #tpu.memory_space<vmem>>, %arg3: memref<2x8x128xf32, #tpu.memory_space<vmem>>, %arg4: memref<2x1x128xf32, #tpu.memory_space<vmem>>, %arg5: memref<2x1x128xf32, #tpu.memory_space<vmem>>, %arg6: memref<2x1x128xf32, #tpu.memory_space<vmem>>) attributes {dimension_semantics = [#tpu.dimension_semantics<parallel>, #tpu.dimension_semantics<arbitrary>], iteration_bounds = array<i64: 1, 1>, scalar_prefetch = 0 : i64, scratch_operands = 2 : i64, tpu.core_type = #tpu.core_type<tc>, window_params = [{transform_indices = @transform_0, window_bounds = array<i64: 2, 8, 128>}, {transform_indices = @transform_1, window_bounds = array<i64: 2, 8, 128>}, {transform_indices = @transform_2, window_bounds = array<i64: 2, 1, 128>}]} {
    %c0_i32 = arith.constant 0 : i32
    %0 = arith.cmpi eq, %arg1, %c0_i32 : i32
    %1 = arith.extui %0 : i1 to i32
    %c0_i32_0 = arith.constant 0 : i32
    %2 = arith.cmpi ne, %1, %c0_i32_0 : i32
    scf.if %2 {
      %cst_21 = arith.constant 0.000000e+00 : f32
      %22 = vector.broadcast %cst_21 : f32 to vector<2x1x128xf32>
      %c0_22 = arith.constant 0 : index
      %c0_23 = arith.constant 0 : index
      %c0_24 = arith.constant 0 : index
      %23 = vector.load %arg5[%c0_22, %c0_23, %c0_24] : memref<2x1x128xf32, #tpu.memory_space<vmem>>, vector<2x1x128xf32>
      tpu.vector_store %arg5[%c0_22, %c0_23, %c0_24], %22 {strides = array<i32>} : memref<2x1x128xf32, #tpu.memory_space<vmem>>, vector<2x1x128xf32>,
      %cst_25 = arith.constant 0.000000e+00 : f32
      %24 = vector.broadcast %cst_25 : f32 to vector<2x1x128xf32>
      %c0_26 = arith.constant 0 : index
      %c0_27 = arith.constant 0 : index
      %c0_28 = arith.constant 0 : index
      %25 = vector.load %arg6[%c0_26, %c0_27, %c0_28] : memref<2x1x128xf32, #tpu.memory_space<vmem>>, vector<2x1x128xf32>
      tpu.vector_store %arg6[%c0_26, %c0_27, %c0_28], %24 {strides = array<i32>} : memref<2x1x128xf32, #tpu.memory_space<vmem>>, vector<2x1x128xf32>,
    } else {
    }
    %c0 = arith.constant 0 : index
    %c0_1 = arith.constant 0 : index
    %c0_2 = arith.constant 0 : index
    %3 = vector.load %arg2[%c0, %c0_1, %c0_2] : memref<2x8x128xf32, #tpu.memory_space<vmem>>, vector<2x8x128xf32>
    %c0_3 = arith.constant 0 : index
    %c0_4 = arith.constant 0 : index
    %c0_5 = arith.constant 0 : index
    %4 = vector.load %arg3[%c0_3, %c0_4, %c0_5] : memref<2x8x128xf32, #tpu.memory_space<vmem>>, vector<2x8x128xf32>
    %5 = arith.mulf %3, %4 : vector<2x8x128xf32>
    %6 = arith.mulf %3, %3 : vector<2x8x128xf32>
    %7 = arith.mulf %4, %4 : vector<2x8x128xf32>
    %8 = arith.addf %6, %7 : vector<2x8x128xf32>
    %c0_6 = arith.constant 0 : index
    %c0_7 = arith.constant 0 : index
    %c0_8 = arith.constant 0 : index
    %9 = vector.load %arg5[%c0_6, %c0_7, %c0_8] : memref<2x1x128xf32, #tpu.memory_space<vmem>>, vector<2x1x128xf32>
    %cst = arith.constant dense<0.000000e+00> : vector<2x128xf32>
    %10 = vector.multi_reduction <add>, %5, %cst [1] : vector<2x8x128xf32> to vector<2x128xf32>
    %11 = vector.shape_cast %10 : vector<2x128xf32> to vector<2x1x128xf32>
    %12 = arith.addf %9, %11 : vector<2x1x128xf32>
    %c0_9 = arith.constant 0 : index
    %c0_10 = arith.constant 0 : index
    %c0_11 = arith.constant 0 : index
    %13 = vector.load %arg5[%c0_9, %c0_10, %c0_11] : memref<2x1x128xf32, #tpu.memory_space<vmem>>, vector<2x1x128xf32>
    tpu.vector_store %arg5[%c0_9, %c0_10, %c0_11], %12 {strides = array<i32>} : memref<2x1x128xf32, #tpu.memory_space<vmem>>, vector<2x1x128xf32>,
    %c0_12 = arith.constant 0 : index
    %c0_13 = arith.constant 0 : index
    %c0_14 = arith.constant 0 : index
    %14 = vector.load %arg6[%c0_12, %c0_13, %c0_14] : memref<2x1x128xf32, #tpu.memory_space<vmem>>, vector<2x1x128xf32>
    %cst_15 = arith.constant dense<0.000000e+00> : vector<2x128xf32>
    %15 = vector.multi_reduction <add>, %8, %cst_15 [1] : vector<2x8x128xf32> to vector<2x128xf32>
    %16 = vector.shape_cast %15 : vector<2x128xf32> to vector<2x1x128xf32>
    %17 = arith.addf %14, %16 : vector<2x1x128xf32>
    %c0_16 = arith.constant 0 : index
    %c0_17 = arith.constant 0 : index
    %c0_18 = arith.constant 0 : index
    %18 = vector.load %arg6[%c0_16, %c0_17, %c0_18] : memref<2x1x128xf32, #tpu.memory_space<vmem>>, vector<2x1x128xf32>
    tpu.vector_store %arg6[%c0_16, %c0_17, %c0_18], %17 {strides = array<i32>} : memref<2x1x128xf32, #tpu.memory_space<vmem>>, vector<2x1x128xf32>,
    %c0_i32_19 = arith.constant 0 : i32
    %19 = arith.cmpi eq, %arg1, %c0_i32_19 : i32
    %20 = arith.extui %19 : i1 to i32
    %c0_i32_20 = arith.constant 0 : i32
    %21 = arith.cmpi ne, %20, %c0_i32_20 : i32
    scf.if %21 {
      %c0_21 = arith.constant 0 : index
      %c0_22 = arith.constant 0 : index
      %c0_23 = arith.constant 0 : index
      %22 = vector.load %arg5[%c0_21, %c0_22, %c0_23] : memref<2x1x128xf32, #tpu.memory_space<vmem>>, vector<2x1x128xf32>
      %cst_24 = arith.constant dense<0.000000e+00> : vector<2x1xf32>
      %23 = vector.multi_reduction <add>, %22, %cst_24 [2] : vector<2x1x128xf32> to vector<2x1xf32>
      %24 = vector.shape_cast %23 : vector<2x1xf32> to vector<2x1x1xf32>
      %cst_25 = arith.constant 1.000000e+00 : f32
      %25 = vector.broadcast %cst_25 : f32 to vector<2x1x1xf32>
      %26 = arith.addf %24, %25 : vector<2x1x1xf32>
      %c0_26 = arith.constant 0 : index
      %c0_27 = arith.constant 0 : index
      %c0_28 = arith.constant 0 : index
      %27 = vector.load %arg6[%c0_26, %c0_27, %c0_28] : memref<2x1x128xf32, #tpu.memory_space<vmem>>, vector<2x1x128xf32>
      %cst_29 = arith.constant dense<0.000000e+00> : vector<2x1xf32>
      %28 = vector.multi_reduction <add>, %27, %cst_29 [2] : vector<2x1x128xf32> to vector<2x1xf32>
      %29 = vector.shape_cast %28 : vector<2x1xf32> to vector<2x1x1xf32>
      %cst_30 = arith.constant 1.000000e+00 : f32
      %30 = vector.broadcast %cst_30 : f32 to vector<2x1x1xf32>
      %31 = arith.addf %29, %30 : vector<2x1x1xf32>
      %32 = arith.divf %26, %31 : vector<2x1x1xf32>
      %cst_31 = arith.constant 1.000000e+00 : f32
      %33 = vector.broadcast %cst_31 : f32 to vector<2x1x1xf32>
      %34 = arith.subf %33, %32 : vector<2x1x1xf32>
      %35 = vector.shape_cast %34 : vector<2x1x1xf32> to vector<2x1x1xf32>
      %36 = vector.broadcast %35 : vector<2x1x1xf32> to vector<2x1x128xf32>
      %c0_32 = arith.constant 0 : index
      %c0_33 = arith.constant 0 : index
      %c0_34 = arith.constant 0 : index
      %37 = vector.load %arg4[%c0_32, %c0_33, %c0_34] : memref<2x1x128xf32, #tpu.memory_space<vmem>>, vector<2x1x128xf32>
      tpu.vector_store %arg4[%c0_32, %c0_33, %c0_34], %36 {strides = array<i32>} : memref<2x1x128xf32, #tpu.memory_space<vmem>>, vector<2x1x128xf32>,
    } else {
    }
    return
  }
  func.func @transform_0(%arg0: i32, %arg1: i32) -> (i32, i32, i32) {
    %c0_i32 = arith.constant 0 : i32
    %c0_i32_0 = arith.constant 0 : i32
    return %arg0, %arg1, %c0_i32 : i32, i32, i32
  }
  func.func @transform_1(%arg0: i32, %arg1: i32) -> (i32, i32, i32) {
    %c0_i32 = arith.constant 0 : i32
    %c0_i32_0 = arith.constant 0 : i32
    return %arg0, %arg1, %c0_i32 : i32, i32, i32
  }
  func.func @transform_2(%arg0: i32, %arg1: i32) -> (i32, i32, i32) {
    %c0_i32 = arith.constant 0 : i32
    %c0_i32_0 = arith.constant 0 : i32
    %c0_i32_1 = arith.constant 0 : i32
    return %arg0, %c0_i32, %c0_i32_0 : i32, i32, i32
  }
}

</mosaic_0001>

<bundles_post_ra>
// kernel: tpu_custom_call.1
= control target key start
LH: loop header
LB: loop body
LE: loop exit
PB: predicated region body
PF: predicated region fallthrough
CT: control target
= control target key end

     0   :  { %7 = vsyncpa [#allocation5], 0  ;;  %s289_s0 = inlined_call_operand.hbm [shape: f32[2,8,128], index: 0, kind: input, shape index: {}]   ;;  %s290_s1 = inlined_call_operand.hbm [shape: f32[2,8,128], index: 1, kind: input, shape index: {}]   ;;  %s291_s2 = inlined_call_operand.hbm [shape: f32[2,1,128], index: 2, kind: output, shape index: {}]  }
   0x1   :  { %8 = vsyncpa [#allocation8], 0 }
   0x2   :  { %9 = vsyncpa [#allocation6], 0  ;;  %s230_s9 = smov [#allocation4]   ;;  %s158_s13 = scalar_lea.hbm %s289_s0, 256 }
   0x3   :  { %s15_s10 = sshll.u32 %s230_s9, 4  ;;  %p159_p0 = scmp.ne.s32.totalorder %s289_s0, %s158_s13  ;;  %s16_s10 = int_to_ptr.vmem [resolvable:$true] %s15_s10 }
   0x4   :  { %p162_p1 = scmp.lt.u32.totalorder %s158_s13, %s289_s0 }
   0x6   :  { %p164_p2 = pnand %p162_p1, %p159_p0 }
   0x8   :  { %167 = shalt.err (!%p164_p2)
}
   0x9   :  { %s168_s18 = scalar_lea.vmem %s16_s10, 256  ;;  %p173_p4 = scmp.lt.s32.totalorder %s16_s10, %s16_s10 }
   0xa   :  { %p169_p3 = scmp.ne.s32.totalorder %s16_s10, %s168_s18  ;;  %p174_p5 = scmp.lt.s32.totalorder %s168_s18, %s168_s18 }
   0xc   :  { %p175_p6 = por %p174_p5, %p173_p4 }
   0xe   :  { %p176_p7 = pnand %p175_p6, %p169_p3 }
  0x10   :  { %179 = shalt.err (!%p176_p7)
}
  0x11   :  { %s231_s19 = smov 128   ;;  %s232_s20 = smov 8  }
  0x12   :  { %21 = dma.hbm_to_vmem [thread:$0]  %s289_s0, 256, %s16_s10, [#allocation5], %s231_s19, %s231_s19, %s232_s20  }
  0x13   :  { %s233_s23 = smov [#allocation7]   ;;  %s180_s27 = scalar_lea.hbm %s290_s1, 256 }
  0x14   :  { %s27_s24 = sshll.u32 %s233_s23, 4  ;;  %p181_p8 = scmp.ne.s32.totalorder %s290_s1, %s180_s27  ;;  %s28_s24 = int_to_ptr.vmem [resolvable:$true] %s27_s24 }
  0x15   :  { %p184_p9 = scmp.lt.u32.totalorder %s180_s27, %s290_s1 }
  0x17   :  { %p186_p10 = pnand %p184_p9, %p181_p8 }
  0x19   :  { %189 = shalt.err (!%p186_p10)
}
  0x1a   :  { %s190_s4 = scalar_lea.vmem %s28_s24, 256  ;;  %p195_p12 = scmp.lt.s32.totalorder %s28_s24, %s28_s24 }
  0x1b   :  { %p191_p11 = scmp.ne.s32.totalorder %s28_s24, %s190_s4  ;;  %p196_p13 = scmp.lt.s32.totalorder %s190_s4, %s190_s4 }
  0x1d   :  { %p197_p0 = por %p196_p13, %p195_p12 }
  0x1f   :  { %p198_p1 = pnand %p197_p0, %p191_p11 }
  0x21   :  { %201 = shalt.err (!%p198_p1)
}
  0x22   :  { %33 = dma.hbm_to_vmem [thread:$0]  %s290_s1, 256, %s28_s24, [#allocation8], %s231_s19, %s231_s19, %s232_s20  }
  0x23   :  { %224 = dma.done.wait [#allocation5], 256  }
  0x24   :  { %225 = vsyncadd [#allocation5], 4294967040 }
  0x25   :  { %226 = dma.done.wait [#allocation8], 256  }
  0x26   :  { %227 = vsyncadd [#allocation8], 4294967040  ;;  %v234_v0 = vmov 0.0   ;;  %v48_v1 = vld [vmem:[#allocation4] sm:$0xff]  ;;  %v50_v2 = vld [vmem:[#allocation7] sm:$0xff]  ;;  %vm101_vm0 = vcmask 1040384  }
  0x27   :  { %46 = vst [vmem:[#allocation3] sm:$0x1] %v234_v0  ;;  %44 = vst [vmem:[#allocation2] sm:$0x1] %v234_v0  ;;  %v49_v3 = vld [vmem:[#allocation4 + $0x8] sm:$0xff]  ;;  %v54_v4 = vmul.f32 %v48_v1, %v48_v1  ;;  %v56_v5 = vmul.f32 %v50_v2, %v50_v2  ;;  %v51_v6 = vld [vmem:[#allocation7 + $0x8] sm:$0xff]  ;;  %v52_v8 = vmul.f32 %v50_v2, %v48_v1 }
  0x28   :  { %45 = vst [vmem:[#allocation2 + $0x1] sm:$0x1] %v234_v0  ;;  %47 = vst [vmem:[#allocation3 + $0x1] sm:$0x1] %v234_v0  ;;  %v55_v7 = vmul.f32 %v49_v3, %v49_v3  ;;  %v57_v9 = vmul.f32 %v51_v6, %v51_v6  ;;  %v53_v10 = vmul.f32 %v51_v6, %v49_v3  ;;  %s235_s1 = smov [#allocation9]  }
  0x29   :  { %v58_v11 = vadd.f32 %v56_v5, %v54_v4  ;;  %v62_v12 = vrot.slane %v52_v8, 4  ;;  %s133_s6 = sshll.u32 %s235_s1, 4  ;;  %s134_s6 = int_to_ptr.vmem [resolvable:$true] %s133_s6 }
  0x2a   :  { %v59_v13 = vadd.f32 %v57_v9, %v55_v7  ;;  %v68_v14 = vrot.slane %v53_v10, 4  ;;  %s202_s7 = scalar_lea.vmem %s134_s6, 32  ;;  %p207_p3 = scmp.lt.s32.totalorder %s134_s6, %s134_s6 }
  0x2b   :  { %v80_v15 = vrot.slane %v58_v11, 4  ;;  %v63_v16 = vadd.f32 %v62_v12, %v52_v8  ;;  %p203_p2 = scmp.ne.s32.totalorder %s134_s6, %s202_s7  ;;  %p208_p4 = scmp.lt.s32.totalorder %s202_s7, %s202_s7 }
  0x2c   :  { %v86_v17 = vrot.slane %v59_v13, 4  ;;  %v69_v18 = vadd.f32 %v68_v14, %v53_v10 }
  0x2d   :  { %v81_v19 = vadd.f32 %v80_v15, %v58_v11  ;;  %v64_v20 = vrot.slane %v63_v16, 2  ;;  %p209_p5 = por %p208_p4, %p207_p3 }
  0x2e   :  { %v87_v21 = vadd.f32 %v86_v17, %v59_v13  ;;  %v70_v22 = vrot.slane %v69_v18, 2  ;;  %v60_v30 = vld [vmem:[#allocation2] sm:$0x1]  ;;  %v78_v35 = vld [vmem:[#allocation3] sm:$0x1] }
  0x2f   :  { %v82_v23 = vrot.slane %v81_v19, 2  ;;  %v65_v24 = vadd.f32 %v64_v20, %v63_v16  ;;  %v61_v34 = vld [vmem:[#allocation2 + $0x1] sm:$0x1]  ;;  %v79_v39 = vld [vmem:[#allocation3 + $0x1] sm:$0x1]  ;;  %p210_p6 = pnand %p209_p5, %p203_p2 }
  0x30   :  { %v88_v25 = vrot.slane %v87_v21, 2  ;;  %v71_v26 = vadd.f32 %v70_v22, %v69_v18 }
  0x31   :  { %v83_v27 = vadd.f32 %v82_v23, %v81_v19  ;;  %v66_v28 = vrot.slane %v65_v24, 1 }
  0x32   :  { %v89_v29 = vadd.f32 %v88_v25, %v87_v21  ;;  %v72_v31 = vrot.slane %v71_v26, 1 }
  0x33   :  { %v84_v32 = vrot.slane %v83_v27, 1  ;;  %v67_v33 = vadd.f32 %v66_v28, %v65_v24 }
  0x34   :  { %v90_v36 = vrot.slane %v89_v29, 1  ;;  %v73_v37 = vadd.f32 %v72_v31, %v71_v26 }
  0x35   :  { %v85_v38 = vadd.f32 %v84_v32, %v83_v27  ;;  %v74_v40 = vadd.f32 %v67_v33, %v60_v30 }
  0x36   :  { %v91_v41 = vadd.f32 %v90_v36, %v89_v29  ;;  %v75_v42 = vadd.f32 %v73_v37, %v61_v34 }
  0x37   :  { %v92_v43 = vadd.f32 %v85_v38, %v78_v35  ;;  %76 = vst [vmem:[#allocation2] sm:$0x1] %v74_v40 }
  0x38   :  { %v93_v44 = vadd.f32 %v91_v41, %v79_v39  ;;  %77 = vst [vmem:[#allocation2 + $0x1] sm:$0x1] %v75_v42 }
  0x39   :  { %94 = vst [vmem:[#allocation3] sm:$0x1] %v92_v43 }
  0x3a   :  { %95 = vst [vmem:[#allocation3 + $0x1] sm:$0x1] %v93_v44 }
  0x3e   :  { %v99_v45 = vld [vmem:[#allocation2] sm:$0x1] }
  0x3f   :  { %v102_v46 = vsel %vm101_vm0, %v99_v45, 0.0  ;;  %v100_v47 = vld [vmem:[#allocation2 + $0x1] sm:$0x1] }
  0x40   :  { %v110_v48 = vld [vmem:[#allocation3] sm:$0x1]  ;;  %103 = vadd.xlane.f32.xlu1 %v102_v46  ;;  %v105_v51 = vsel %vm101_vm0, %v100_v47, 0.0 }
  0x41   :  { %v112_v49 = vsel %vm101_vm0, %v110_v48, 0.0  ;;  %v111_v50 = vld [vmem:[#allocation3 + $0x1] sm:$0x1] }
  0x42   :  { %113 = vadd.xlane.f32.xlu0 %v112_v49  ;;  %v115_v52 = vsel %vm101_vm0, %v111_v50, 0.0 }
  0x44   :  { %106 = vadd.xlane.f32.xlu1 %v105_v51 }
  0x46   :  { %116 = vadd.xlane.f32.xlu0 %v115_v52 }
  0xcd   :  { %v104_v57 = vpop.xlane.xlu1 %103 }
  0xce   :  { %v108_v58 = vadd.f32 1.0, %v104_v57 }
  0xcf   :  { %v114_v53 = vpop.xlane.xlu0 %113 }
  0xd0   :  { %v118_v54 = vadd.f32 1.0, %v114_v53 }
  0xd1   :  { %v107_v59 = vpop.xlane.xlu1 %106 }
  0xd2   :  { %154 = vrcp.f32 %v118_v54  ;;  %v109_v62 = vadd.f32 1.0, %v107_v59 }
  0xd3   :  { %v117_v55 = vpop.xlane.xlu0 %116 }
  0xd4   :  { %v119_v56 = vadd.f32 1.0, %v117_v55 }
  0xd6   :  { %156 = vrcp.f32 %v119_v56 }
  0xdc   :  { %v155_v60 = vpop.eup %154 }
  0xdd   :  { %v121_v61 = vmul.f32 %v155_v60, %v108_v58 }
  0xdf   :  { %v124_v63 = vsub.f32 1.0, %v121_v61 }
  0xe0   :  { %v157_v0 = vpop.eup %156 }
  0xe1   :  { %126 = vst [vmem:[#allocation9] sm:$0x1] %v124_v63  ;;  %v123_v1 = vmul.f32 %v157_v0, %v109_v62 }
  0xe3   :  { %v125_v2 = vsub.f32 1.0, %v123_v1 }
  0xe5   :  { %127 = vst [vmem:[#allocation9 + $0x1] sm:$0x1] %v125_v2 }
  0xe6   :  { %213 = shalt.err (!%p210_p6)
}
  0xe7   :  { %s214_s10 = scalar_lea.hbm %s291_s2, 32 }
  0xe8   :  { %p215_p7 = scmp.ne.s32.totalorder %s291_s2, %s214_s10  ;;  %p218_p8 = scmp.lt.u32.totalorder %s214_s10, %s291_s2 }
  0xea   :  { %p220_p9 = pnand %p218_p8, %p215_p7 }
  0xec   :  { %223 = shalt.err (!%p220_p9)
}
  0xed   :  { %s236_s15 = smov 16   ;;  %s237_s16 = smov 1  }
  0xee   :  { %139 = dma.vmem_to_hbm [thread:$0]  %s134_s6, 32, %s291_s2, [#allocation6], %s236_s15, %s236_s15, %s237_s16  }
  0xef   :  { %228 = dma.done.wait [#allocation6], 32  }
  0xf0   :  { %229 = vsyncadd [#allocation6], 4294967264 }
  0xf1   :  { %143 = vsyncpa [#allocation5], 1 }
  0xf2   :  { %144 = vsyncpa [#allocation8], 1 }
  0xf3   :  { %145 = vsyncpa [#allocation6], 1 }

</bundles_post_ra>
